<compile_context>
chip_gen: v6e
topology: v6e:2x2x1
jax: 0.10.0
libtpu: 0.0.40
codegen_flags: <defaults>
</compile_context>

<pallas_src>
import functools

import jax
import jax.numpy as jnp
from jax.experimental import pallas as pl
from jax.experimental.pallas import tpu as pltpu


def _round_up(x, m):
    return ((x + m - 1) // m) * m


def policy_kernel(states_ref, w1_ref, b1_ref, w2_ref, b2_ref,
                  wh_ref, bh_ref, out_ref, *, n_actions):
    x = states_ref[...]                                    # (TB, n_states)

    # hidden1 + ReLU  (bf16 MXU inputs, f32 accumulation; elementwise in f32)
    h1 = jnp.dot(x.astype(w1_ref.dtype), w1_ref[...],
                 preferred_element_type=jnp.float32)
    h1 = jnp.maximum(h1 + b1_ref[...], 0.0)

    # hidden2 + ReLU
    h2 = jnp.dot(h1.astype(w2_ref.dtype), w2_ref[...],
                 preferred_element_type=jnp.float32)
    h2 = jnp.maximum(h2 + b2_ref[...], 0.0)

    # Fused heads: one MXU push produces [mu | log_std] of width 2*n_actions.
    heads = jnp.dot(h2.astype(wh_ref.dtype), wh_ref[...],
                    preferred_element_type=jnp.float32)
    heads = heads + bh_ref[...]

    # Left half = mu (identity), right half = std = exp(clamp(log_std,-20,2)).
    # Lane-index select avoids cross-lane slicing/concat of sub-128 halves;
    # the wasted exp on the mu lanes rides the otherwise-idle EUP slot
    # (clip to <= 2 prevents overflow).
    col = jax.lax.broadcasted_iota(jnp.int32, heads.shape, dimension=1)
    std_all = jnp.exp(jnp.clip(heads, -20.0, 2.0))
    out_ref[...] = jnp.where(col < n_actions, heads, std_all).astype(out_ref.dtype)


def policy_forward(states, params, *, block_b=512, out_dtype=jnp.float32):
    """Returns (mu, std) of the Normal distribution produced by PolicyNetwork.

    `states` may be float32 or bfloat16 (bf16 halves the dominant input DMA).
    """
    B, n_states = states.shape
    n_hidden = params["w1"].shape[1]
    two_a = params["w_heads"].shape[1]
    n_actions = two_a // 2

    # Batch tile: as large as block_b (default 512, a multiple of 256 for the
    # v6e/v7x MXU), rounded to a multiple of 8 sublanes.  No wrapper padding:
    # the grid is ceil-divided and Mosaic masks the ragged last tile.
    tb = min(block_b, _round_up(B, 8))
    tb = max(8, (tb // 8) * 8)
    # v7x has 2 TensorCores: make sure the "parallel" batch axis has >= 2
    # grid steps whenever the batch is big enough to split.
    if B > 8 and pl.cdiv(B, tb) < 2:
        tb = max(8, _round_up(pl.cdiv(B, 2), 8))
    grid = (pl.cdiv(B, tb),)

    row_map = lambda i: (i, 0)     # batch-tiled arrays (states, output)
    const_map = lambda i: (0, 0)   # VMEM-resident weights / biases

    # Explicit VMEM budget: double-buffered streamed tiles + single-buffered
    # weights + f32 intermediates, x2 headroom, clamped to [32 MiB, 64 MiB]
    # (above v5e's 16 MiB scoped default, within v7x's 64 MiB physical).
    tile_bytes = tb * (2 * n_states * states.dtype.itemsize      # input  (x2 buf)
                       + 2 * two_a * jnp.dtype(out_dtype).itemsize  # output (x2 buf)
                       + 2 * n_hidden * 4)                        # h1/h2 f32
    weight_bytes = sum(int(v.size) * v.dtype.itemsize for v in params.values())
    vmem_limit = int(min(64 << 20, max(32 << 20, 2 * (tile_bytes + weight_bytes))))

    def run(single_buffered_weights):
        if single_buffered_weights:
            # Constant block index -> fetched once; Buffered(1) avoids paying
            # the default double-buffer VMEM cost for resident weights.
            res_spec = lambda s: pl.BlockSpec(s, const_map,
                                              pipeline_mode=pl.Buffered(1))
        else:
            res_spec = lambda s: pl.BlockSpec(s, const_map)

        in_specs = [
            pl.BlockSpec((tb, n_states), row_map),
            res_spec(params["w1"].shape),
            res_spec(params["b1"].shape),
            res_spec(params["w2"].shape),
            res_spec(params["b2"].shape),
            res_spec(params["w_heads"].shape),
            res_spec(params["b_heads"].shape),
        ]
        return pl.pallas_call(
            functools.partial(policy_kernel, n_actions=n_actions),
            out_shape=jax.ShapeDtypeStruct((B, two_a), out_dtype),
            grid=grid,
            in_specs=in_specs,
            out_specs=pl.BlockSpec((tb, two_a), row_map),
            compiler_params=pltpu.CompilerParams(
                dimension_semantics=("parallel",),   # shards batch on v7x's 2 TCs
                vmem_limit_bytes=vmem_limit),
        )(states, params["w1"], params["b1"], params["w2"], params["b2"],
          params["w_heads"], params["b_heads"])

    try:
        fused = run(True)
    except Exception:
        # Fallback for JAX builds without pipeline_mode / Buffered(1) support;
        # genuine kernel errors still surface from the retry.
        fused = run(False)

    mu = fused[:, :n_actions]
    std = fused[:, n_actions:]
    return mu, std


def init_params(key, n_states, n_actions, n_hidden):
    """Deterministic init matching the PyTorch module's __init__ semantics.

    Weights are stored transposed as (in, out) and cast to bf16 (native MXU
    input on v5e/v6e/v7x); biases stay f32 (zero-initialized, as in the module).
    """
    k1, k2, k3, k4 = jax.random.split(key, 4)

    def he_normal(k, fan_in, fan_out):
        # kaiming_normal_ (fan_in mode, gain sqrt(2)) on the (out, in) torch
        # weight; stored here transposed as (in, out).
        std = jnp.sqrt(2.0 / fan_in)
        return jax.random.normal(k, (fan_in, fan_out), jnp.float32) * std

    def xavier_uniform(k, fan_in, fan_out):
        limit = jnp.sqrt(6.0 / (fan_in + fan_out))
        return jax.random.uniform(k, (fan_in, fan_out), jnp.float32,
                                  -limit, limit)

    wmu = xavier_uniform(k3, n_hidden, n_actions)
    wls = xavier_uniform(k4, n_hidden, n_actions)

    # TODO(synk): on v7x, weights could be stored fp8 (e4m3) with per-channel
    # scales folded into the f32 bias; only relevant once n_hidden is large.
    return {
        "w1": he_normal(k1, n_states, n_hidden).astype(jnp.bfloat16),
        "b1": jnp.zeros((1, n_hidden), jnp.float32),
        "w2": he_normal(k2, n_hidden, n_hidden).astype(jnp.bfloat16),
        "b2": jnp.zeros((1, n_hidden), jnp.float32),
        # Fused [Wmu | Wls] and [bmu | bls] heads.
        "w_heads": jnp.concatenate([wmu, wls], axis=1).astype(jnp.bfloat16),
        "b_heads": jnp.zeros((1, 2 * n_actions), jnp.float32),
    }


def reference_forward(states, p):
    """Pure-JAX reference with identical numerics (bf16 matmul operands)."""
    n_actions = p["w_heads"].shape[1] // 2
    h1 = jnp.dot(states.astype(jnp.bfloat16), p["w1"],
                 preferred_element_type=jnp.float32) + p["b1"]
    h1 = jnp.maximum(h1, 0.0)
    h2 = jnp.dot(h1.astype(jnp.bfloat16), p["w2"],
                 preferred_element_type=jnp.float32) + p["b2"]
    h2 = jnp.maximum(h2, 0.0)
    heads = jnp.dot(h2.astype(jnp.bfloat16), p["w_heads"],
                    preferred_element_type=jnp.float32) + p["b_heads"]
    mu = heads[:, :n_actions]
    std = jnp.exp(jnp.clip(heads[:, n_actions:], -20.0, 2.0))
    return mu, std


if __name__ == "__main__":
    # Small shapes: batch=8, n_states=16, hidden=32, n_actions=8
    B, n_states, n_hidden, n_actions = 8, 16, 32, 8

    key = jax.random.PRNGKey(0)
    k_params, k_states = jax.random.split(key)

    params = init_params(k_params, n_states, n_actions, n_hidden)
    states = jax.random.normal(k_states, (B, n_states), jnp.float32)

    mu, std = policy_forward(states, params)
    jax.block_until_ready((mu, std))

    mu_ref, std_ref = reference_forward(states, params)
    assert mu.shape == (B, n_actions) and std.shape == (B, n_actions)
    assert jnp.allclose(mu, mu_ref, atol=1e-4, rtol=1e-4)
    assert jnp.allclose(std, std_ref, atol=1e-4, rtol=1e-4)
    assert bool(jnp.all(std > 0.0))

    # Ragged / multi-tile path: B not a multiple of the batch tile; exercises
    # the >=2-grid-step split and Mosaic's masked last tile (no wrapper pad).
    B2 = 20
    states2 = jax.random.normal(jax.random.PRNGKey(1), (B2, n_states),
                                jnp.float32)
    mu2, std2 = policy_forward(states2, params)
    jax.block_until_ready((mu2, std2))
    mu2_ref, std2_ref = reference_forward(states2, params)
    assert mu2.shape == (B2, n_actions) and std2.shape == (B2, n_actions)
    assert jnp.allclose(mu2, mu2_ref, atol=1e-4, rtol=1e-4)
    assert jnp.allclose(std2, std2_ref, atol=1e-4, rtol=1e-4)

    # TODO(synk): sample_or_likelihood (rsample / tanh-squash / log_prob) is a
    # stochastic method outside forward(); not implemented in-kernel.
    print("KERNEL_OK")
</pallas_src>

<mosaic_0001>
module attributes {stable_mosaic.version = 11 : i64} {
  func.func @policy_kernel(%arg0: i32, %arg1: memref<8x16xf32, #tpu.memory_space<vmem>>, %arg2: memref<16x32xbf16, #tpu.memory_space<vmem>>, %arg3: memref<1x32xf32, #tpu.memory_space<vmem>>, %arg4: memref<32x32xbf16, #tpu.memory_space<vmem>>, %arg5: memref<1x32xf32, #tpu.memory_space<vmem>>, %arg6: memref<32x16xbf16, #tpu.memory_space<vmem>>, %arg7: memref<1x16xf32, #tpu.memory_space<vmem>>, %arg8: memref<8x16xf32, #tpu.memory_space<vmem>>) attributes {dimension_semantics = [#tpu.dimension_semantics<parallel>], iteration_bounds = array<i64: 1>, scalar_prefetch = 0 : i64, scratch_operands = 0 : i64, tpu.core_type = #tpu.core_type<tc>, window_params = [{transform_indices = @transform_0, window_bounds = array<i64: 8, 16>}, {pipeline_mode = #tpu.pipeline_mode<synchronous>, transform_indices = @transform_1, window_bounds = array<i64: 16, 32>}, {pipeline_mode = #tpu.pipeline_mode<synchronous>, transform_indices = @transform_2, window_bounds = array<i64: 1, 32>}, {pipeline_mode = #tpu.pipeline_mode<synchronous>, transform_indices = @transform_3, window_bounds = array<i64: 32, 32>}, {pipeline_mode = #tpu.pipeline_mode<synchronous>, transform_indices = @transform_4, window_bounds = array<i64: 1, 32>}, {pipeline_mode = #tpu.pipeline_mode<synchronous>, transform_indices = @transform_5, window_bounds = array<i64: 32, 16>}, {pipeline_mode = #tpu.pipeline_mode<synchronous>, transform_indices = @transform_6, window_bounds = array<i64: 1, 16>}, {transform_indices = @transform_7, window_bounds = array<i64: 8, 16>}]} {
    %c0 = arith.constant 0 : index
    %c0_0 = arith.constant 0 : index
    %0 = vector.load %arg1[%c0, %c0_0] : memref<8x16xf32, #tpu.memory_space<vmem>>, vector<8x16xf32>
    %1 = arith.truncf %0 : vector<8x16xf32> to vector<8x16xbf16>
    %c0_1 = arith.constant 0 : index
    %c0_2 = arith.constant 0 : index
    %2 = vector.load %arg2[%c0_1, %c0_2] : memref<16x32xbf16, #tpu.memory_space<vmem>>, vector<16x32xbf16>
    %cst = arith.constant dense<0.000000e+00> : vector<8x32xf32>
    %3 = tpu.matmul %1, %2, %cst {dimension_numbers = #tpu.dot_dimension_numbers<[1], [0], [0], [1], [0, 0, 1, 1], [], []>} : vector<8x16xbf16>, vector<16x32xbf16>, vector<8x32xf32> -> vector<8x32xf32>
    %c0_3 = arith.constant 0 : index
    %c0_4 = arith.constant 0 : index
    %4 = vector.load %arg3[%c0_3, %c0_4] : memref<1x32xf32, #tpu.memory_space<vmem>>, vector<1x32xf32>
    %5 = vector.broadcast %4 : vector<1x32xf32> to vector<8x32xf32>
    %6 = arith.addf %3, %5 : vector<8x32xf32>
    %cst_5 = arith.constant 0.000000e+00 : f32
    %7 = vector.broadcast %cst_5 : f32 to vector<8x32xf32>
    %8 = arith.maximumf %6, %7 : vector<8x32xf32>
    %9 = arith.truncf %8 : vector<8x32xf32> to vector<8x32xbf16>
    %c0_6 = arith.constant 0 : index
    %c0_7 = arith.constant 0 : index
    %10 = vector.load %arg4[%c0_6, %c0_7] : memref<32x32xbf16, #tpu.memory_space<vmem>>, vector<32x32xbf16>
    %cst_8 = arith.constant dense<0.000000e+00> : vector<8x32xf32>
    %11 = tpu.matmul %9, %10, %cst_8 {dimension_numbers = #tpu.dot_dimension_numbers<[1], [0], [0], [1], [0, 0, 1, 1], [], []>} : vector<8x32xbf16>, vector<32x32xbf16>, vector<8x32xf32> -> vector<8x32xf32>
    %c0_9 = arith.constant 0 : index
    %c0_10 = arith.constant 0 : index
    %12 = vector.load %arg5[%c0_9, %c0_10] : memref<1x32xf32, #tpu.memory_space<vmem>>, vector<1x32xf32>
    %13 = vector.broadcast %12 : vector<1x32xf32> to vector<8x32xf32>
    %14 = arith.addf %11, %13 : vector<8x32xf32>
    %cst_11 = arith.constant 0.000000e+00 : f32
    %15 = vector.broadcast %cst_11 : f32 to vector<8x32xf32>
    %16 = arith.maximumf %14, %15 : vector<8x32xf32>
    %17 = arith.truncf %16 : vector<8x32xf32> to vector<8x32xbf16>
    %c0_12 = arith.constant 0 : index
    %c0_13 = arith.constant 0 : index
    %18 = vector.load %arg6[%c0_12, %c0_13] : memref<32x16xbf16, #tpu.memory_space<vmem>>, vector<32x16xbf16>
    %cst_14 = arith.constant dense<0.000000e+00> : vector<8x16xf32>
    %19 = tpu.matmul %17, %18, %cst_14 {dimension_numbers = #tpu.dot_dimension_numbers<[1], [0], [0], [1], [0, 0, 1, 1], [], []>} : vector<8x32xbf16>, vector<32x16xbf16>, vector<8x16xf32> -> vector<8x16xf32>
    %c0_15 = arith.constant 0 : index
    %c0_16 = arith.constant 0 : index
    %20 = vector.load %arg7[%c0_15, %c0_16] : memref<1x16xf32, #tpu.memory_space<vmem>>, vector<1x16xf32>
    %21 = vector.broadcast %20 : vector<1x16xf32> to vector<8x16xf32>
    %22 = arith.addf %19, %21 : vector<8x16xf32>
    %23 = tpu.iota {dimensions = array<i32: 1>} : vector<8x16xi32>
    %cst_17 = arith.constant -2.000000e+01 : f32
    %cst_18 = arith.constant 2.000000e+00 : f32
    %24 = vector.broadcast %cst_17 : f32 to vector<8x16xf32>
    %25 = arith.maximumf %24, %22 : vector<8x16xf32>
    %26 = vector.broadcast %cst_18 : f32 to vector<8x16xf32>
    %27 = arith.minimumf %26, %25 : vector<8x16xf32>
    %28 = math.exp %27 : vector<8x16xf32>
    %c8_i32 = arith.constant 8 : i32
    %29 = vector.broadcast %c8_i32 : i32 to vector<8x16xi32>
    %30 = arith.cmpi slt, %23, %29 : vector<8x16xi32>
    %31 = arith.select %30, %22, %28 : vector<8x16xi1>, vector<8x16xf32>
    %c0_19 = arith.constant 0 : index
    %c0_20 = arith.constant 0 : index
    %32 = vector.load %arg8[%c0_19, %c0_20] : memref<8x16xf32, #tpu.memory_space<vmem>>, vector<8x16xf32>
    tpu.vector_store %arg8[%c0_19, %c0_20], %31 {strides = array<i32>} : memref<8x16xf32, #tpu.memory_space<vmem>>, vector<8x16xf32>,
    return
  }
  func.func @transform_0(%arg0: i32) -> (i32, i32) {
    %c0_i32 = arith.constant 0 : i32
    %c0_i32_0 = arith.constant 0 : i32
    return %arg0, %c0_i32 : i32, i32
  }
  func.func @transform_1(%arg0: i32) -> (i32, i32) {
    %c0_i32 = arith.constant 0 : i32
    %c0_i32_0 = arith.constant 0 : i32
    %c0_i32_1 = arith.constant 0 : i32
    return %c0_i32, %c0_i32_0 : i32, i32
  }
  func.func @transform_2(%arg0: i32) -> (i32, i32) {
    %c0_i32 = arith.constant 0 : i32
    %c0_i32_0 = arith.constant 0 : i32
    %c0_i32_1 = arith.constant 0 : i32
    return %c0_i32, %c0_i32_0 : i32, i32
  }
  func.func @transform_3(%arg0: i32) -> (i32, i32) {
    %c0_i32 = arith.constant 0 : i32
    %c0_i32_0 = arith.constant 0 : i32
    %c0_i32_1 = arith.constant 0 : i32
    return %c0_i32, %c0_i32_0 : i32, i32
  }
  func.func @transform_4(%arg0: i32) -> (i32, i32) {
    %c0_i32 = arith.constant 0 : i32
    %c0_i32_0 = arith.constant 0 : i32
    %c0_i32_1 = arith.constant 0 : i32
    return %c0_i32, %c0_i32_0 : i32, i32
  }
  func.func @transform_5(%arg0: i32) -> (i32, i32) {
    %c0_i32 = arith.constant 0 : i32
    %c0_i32_0 = arith.constant 0 : i32
    %c0_i32_1 = arith.constant 0 : i32
    return %c0_i32, %c0_i32_0 : i32, i32
  }
  func.func @transform_6(%arg0: i32) -> (i32, i32) {
    %c0_i32 = arith.constant 0 : i32
    %c0_i32_0 = arith.constant 0 : i32
    %c0_i32_1 = arith.constant 0 : i32
    return %c0_i32, %c0_i32_0 : i32, i32
  }
  func.func @transform_7(%arg0: i32) -> (i32, i32) {
    %c0_i32 = arith.constant 0 : i32
    %c0_i32_0 = arith.constant 0 : i32
    return %arg0, %c0_i32 : i32, i32
  }
}

module attributes {stable_mosaic.version = 11 : i64} {
  func.func @policy_kernel(%arg0: i32, %arg1: memref<8x16xf32, #tpu.memory_space<vmem>>, %arg2: memref<16x32xbf16, #tpu.memory_space<vmem>>, %arg3: memref<1x32xf32, #tpu.memory_space<vmem>>, %arg4: memref<32x32xbf16, #tpu.memory_space<vmem>>, %arg5: memref<1x32xf32, #tpu.memory_space<vmem>>, %arg6: memref<32x16xbf16, #tpu.memory_space<vmem>>, %arg7: memref<1x16xf32, #tpu.memory_space<vmem>>, %arg8: memref<8x16xf32, #tpu.memory_space<vmem>>) attributes {dimension_semantics = [#tpu.dimension_semantics<parallel>], iteration_bounds = array<i64: 1>, scalar_prefetch = 0 : i64, scratch_operands = 0 : i64, tpu.core_type = #tpu.core_type<tc>, window_params = [{transform_indices = @transform_0, window_bounds = array<i64: 8, 16>}, {pipeline_mode = #tpu.pipeline_mode<synchronous>, transform_indices = @transform_1, window_bounds = array<i64: 16, 32>}, {pipeline_mode = #tpu.pipeline_mode<synchronous>, transform_indices = @transform_2, window_bounds = array<i64: 1, 32>}, {pipeline_mode = #tpu.pipeline_mode<synchronous>, transform_indices = @transform_3, window_bounds = array<i64: 32, 32>}, {pipeline_mode = #tpu.pipeline_mode<synchronous>, transform_indices = @transform_4, window_bounds = array<i64: 1, 32>}, {pipeline_mode = #tpu.pipeline_mode<synchronous>, transform_indices = @transform_5, window_bounds = array<i64: 32, 16>}, {pipeline_mode = #tpu.pipeline_mode<synchronous>, transform_indices = @transform_6, window_bounds = array<i64: 1, 16>}, {transform_indices = @transform_7, window_bounds = array<i64: 8, 16>}]} {
    %c0 = arith.constant 0 : index
    %c0_0 = arith.constant 0 : index
    %0 = vector.load %arg1[%c0, %c0_0] : memref<8x16xf32, #tpu.memory_space<vmem>>, vector<8x16xf32>
    %1 = arith.truncf %0 : vector<8x16xf32> to vector<8x16xbf16>
    %c0_1 = arith.constant 0 : index
    %c0_2 = arith.constant 0 : index
    %2 = vector.load %arg2[%c0_1, %c0_2] : memref<16x32xbf16, #tpu.memory_space<vmem>>, vector<16x32xbf16>
    %cst = arith.constant dense<0.000000e+00> : vector<8x32xf32>
    %3 = tpu.matmul %1, %2, %cst {dimension_numbers = #tpu.dot_dimension_numbers<[1], [0], [0], [1], [0, 0, 1, 1], [], []>} : vector<8x16xbf16>, vector<16x32xbf16>, vector<8x32xf32> -> vector<8x32xf32>
    %c0_3 = arith.constant 0 : index
    %c0_4 = arith.constant 0 : index
    %4 = vector.load %arg3[%c0_3, %c0_4] : memref<1x32xf32, #tpu.memory_space<vmem>>, vector<1x32xf32>
    %5 = vector.broadcast %4 : vector<1x32xf32> to vector<8x32xf32>
    %6 = arith.addf %3, %5 : vector<8x32xf32>
    %cst_5 = arith.constant 0.000000e+00 : f32
    %7 = vector.broadcast %cst_5 : f32 to vector<8x32xf32>
    %8 = arith.maximumf %6, %7 : vector<8x32xf32>
    %9 = arith.truncf %8 : vector<8x32xf32> to vector<8x32xbf16>
    %c0_6 = arith.constant 0 : index
    %c0_7 = arith.constant 0 : index
    %10 = vector.load %arg4[%c0_6, %c0_7] : memref<32x32xbf16, #tpu.memory_space<vmem>>, vector<32x32xbf16>
    %cst_8 = arith.constant dense<0.000000e+00> : vector<8x32xf32>
    %11 = tpu.matmul %9, %10, %cst_8 {dimension_numbers = #tpu.dot_dimension_numbers<[1], [0], [0], [1], [0, 0, 1, 1], [], []>} : vector<8x32xbf16>, vector<32x32xbf16>, vector<8x32xf32> -> vector<8x32xf32>
    %c0_9 = arith.constant 0 : index
    %c0_10 = arith.constant 0 : index
    %12 = vector.load %arg5[%c0_9, %c0_10] : memref<1x32xf32, #tpu.memory_space<vmem>>, vector<1x32xf32>
    %13 = vector.broadcast %12 : vector<1x32xf32> to vector<8x32xf32>
    %14 = arith.addf %11, %13 : vector<8x32xf32>
    %cst_11 = arith.constant 0.000000e+00 : f32
    %15 = vector.broadcast %cst_11 : f32 to vector<8x32xf32>
    %16 = arith.maximumf %14, %15 : vector<8x32xf32>
    %17 = arith.truncf %16 : vector<8x32xf32> to vector<8x32xbf16>
    %c0_12 = arith.constant 0 : index
    %c0_13 = arith.constant 0 : index
    %18 = vector.load %arg6[%c0_12, %c0_13] : memref<32x16xbf16, #tpu.memory_space<vmem>>, vector<32x16xbf16>
    %cst_14 = arith.constant dense<0.000000e+00> : vector<8x16xf32>
    %19 = tpu.matmul %17, %18, %cst_14 {dimension_numbers = #tpu.dot_dimension_numbers<[1], [0], [0], [1], [0, 0, 1, 1], [], []>} : vector<8x32xbf16>, vector<32x16xbf16>, vector<8x16xf32> -> vector<8x16xf32>
    %c0_15 = arith.constant 0 : index
    %c0_16 = arith.constant 0 : index
    %20 = vector.load %arg7[%c0_15, %c0_16] : memref<1x16xf32, #tpu.memory_space<vmem>>, vector<1x16xf32>
    %21 = vector.broadcast %20 : vector<1x16xf32> to vector<8x16xf32>
    %22 = arith.addf %19, %21 : vector<8x16xf32>
    %23 = tpu.iota {dimensions = array<i32: 1>} : vector<8x16xi32>
    %cst_17 = arith.constant -2.000000e+01 : f32
    %cst_18 = arith.constant 2.000000e+00 : f32
    %24 = vector.broadcast %cst_17 : f32 to vector<8x16xf32>
    %25 = arith.maximumf %24, %22 : vector<8x16xf32>
    %26 = vector.broadcast %cst_18 : f32 to vector<8x16xf32>
    %27 = arith.minimumf %26, %25 : vector<8x16xf32>
    %28 = math.exp %27 : vector<8x16xf32>
    %c8_i32 = arith.constant 8 : i32
    %29 = vector.broadcast %c8_i32 : i32 to vector<8x16xi32>
    %30 = arith.cmpi slt, %23, %29 : vector<8x16xi32>
    %31 = arith.select %30, %22, %28 : vector<8x16xi1>, vector<8x16xf32>
    %c0_19 = arith.constant 0 : index
    %c0_20 = arith.constant 0 : index
    %32 = vector.load %arg8[%c0_19, %c0_20] : memref<8x16xf32, #tpu.memory_space<vmem>>, vector<8x16xf32>
    tpu.vector_store %arg8[%c0_19, %c0_20], %31 {strides = array<i32>} : memref<8x16xf32, #tpu.memory_space<vmem>>, vector<8x16xf32>,
    return
  }
  func.func @transform_0(%arg0: i32) -> (i32, i32) {
    %c0_i32 = arith.constant 0 : i32
    %c0_i32_0 = arith.constant 0 : i32
    return %arg0, %c0_i32 : i32, i32
  }
  func.func @transform_1(%arg0: i32) -> (i32, i32) {
    %c0_i32 = arith.constant 0 : i32
    %c0_i32_0 = arith.constant 0 : i32
    %c0_i32_1 = arith.constant 0 : i32
    return %c0_i32, %c0_i32_0 : i32, i32
  }
  func.func @transform_2(%arg0: i32) -> (i32, i32) {
    %c0_i32 = arith.constant 0 : i32
    %c0_i32_0 = arith.constant 0 : i32
    %c0_i32_1 = arith.constant 0 : i32
    return %c0_i32, %c0_i32_0 : i32, i32
  }
  func.func @transform_3(%arg0: i32) -> (i32, i32) {
    %c0_i32 = arith.constant 0 : i32
    %c0_i32_0 = arith.constant 0 : i32
    %c0_i32_1 = arith.constant 0 : i32
    return %c0_i32, %c0_i32_0 : i32, i32
  }
  func.func @transform_4(%arg0: i32) -> (i32, i32) {
    %c0_i32 = arith.constant 0 : i32
    %c0_i32_0 = arith.constant 0 : i32
    %c0_i32_1 = arith.constant 0 : i32
    return %c0_i32, %c0_i32_0 : i32, i32
  }
  func.func @transform_5(%arg0: i32) -> (i32, i32) {
    %c0_i32 = arith.constant 0 : i32
    %c0_i32_0 = arith.constant 0 : i32
    %c0_i32_1 = arith.constant 0 : i32
    return %c0_i32, %c0_i32_0 : i32, i32
  }
  func.func @transform_6(%arg0: i32) -> (i32, i32) {
    %c0_i32 = arith.constant 0 : i32
    %c0_i32_0 = arith.constant 0 : i32
    %c0_i32_1 = arith.constant 0 : i32
    return %c0_i32, %c0_i32_0 : i32, i32
  }
  func.func @transform_7(%arg0: i32) -> (i32, i32) {
    %c0_i32 = arith.constant 0 : i32
    %c0_i32_0 = arith.constant 0 : i32
    return %arg0, %c0_i32 : i32, i32
  }
}

</mosaic_0001>

<bundles_post_ra>
// kernel: tpu_custom_call.1
= control target key start
LH: loop header
LB: loop body
LE: loop exit
PB: predicated region body
PF: predicated region fallthrough
CT: control target
= control target key end

     0   :  { %12 = vsyncpa [#allocation3], 0  ;;  %s477_s0 = inlined_call_operand.vmem [shape: f32[8,16], index: 0, kind: input, shape index: {}]   ;;  %s478_s1 = inlined_call_operand.hbm [shape: bf16[16,32], index: 1, kind: input, shape index: {}]   ;;  %s479_s2 = inlined_call_operand.vmem [shape: f32[1,32], index: 2, kind: input, shape index: {}]   ;;  %s480_s3 = inlined_call_operand.vmem [shape: bf16[32,32], index: 3, kind: input, shape index: {}]   ;;  %s481_s4 = inlined_call_operand.hbm [shape: f32[1,32], index: 4, kind: input, shape index: {}]   ;;  %s482_s5 = inlined_call_operand.vmem [shape: bf16[32,16], index: 5, kind: input, shape index: {}]   ;;  %s483_s6 = inlined_call_operand.vmem [shape: f32[1,16], index: 6, kind: input, shape index: {}]   ;;  %s484_s7 = inlined_call_operand.hbm [shape: f32[8,16], index: 7, kind: output, shape index: {}]  }
   0x1   :  { %13 = vsyncpa [#allocation6], 0 }
   0x2   :  { %14 = vsyncpa [#allocation4], 0  ;;  %s398_s24 = smov [#allocation2]  }
   0x3   :  { %s22_s25 = sshll.u32 %s398_s24, 4  ;;  %s23_s25 = int_to_ptr.vmem [resolvable:$true] %s22_s25 }
   0x4   :  { %s340_s26 = scalar_lea.vmem %s23_s25, 128  ;;  %p345_p1 = scmp.lt.s32.totalorder %s23_s25, %s23_s25 }
   0x5   :  { %p341_p0 = scmp.ne.s32.totalorder %s23_s25, %s340_s26  ;;  %p346_p2 = scmp.lt.s32.totalorder %s340_s26, %s340_s26 }
   0x7   :  { %p347_p3 = por %p346_p2, %p345_p1 }
   0x9   :  { %p348_p4 = pnand %p347_p3, %p341_p0 }
   0xb   :  { %351 = shalt.err (!%p348_p4)
}
   0xc   :  { %s399_s27 = smov 64   ;;  %s400_s28 = smov 4  }
   0xd   :  { %28 = dma.hbm_to_vmem [thread:$0]  %s478_s1, 128, %s23_s25, [#allocation3], %s399_s27, %s399_s27, %s400_s28  }
   0xe   :  { %s401_s8 = smov [#allocation5]  }
   0xf   :  { %s39_s9 = sshll.u32 %s401_s8, 4  ;;  %s40_s9 = int_to_ptr.vmem [resolvable:$true] %s39_s9 }
  0x10   :  { %s360_s10 = scalar_lea.vmem %s40_s9, 16  ;;  %s364_s11 = scalar_lea.vmem %s40_s9, 32 }
  0x11   :  { %p361_p5 = scmp.ne.s32.totalorder %s40_s9, %s360_s10  ;;  %p365_p6 = scmp.lt.s32.totalorder %s40_s9, %s40_s9 }
  0x12   :  { %p366_p7 = scmp.lt.s32.totalorder %s364_s11, %s360_s10 }
  0x14   :  { %p367_p8 = por %p366_p7, %p365_p6 }
  0x16   :  { %p368_p9 = pnand %p367_p8, %p361_p5 }
  0x18   :  { %371 = shalt.err (!%p368_p9)
}
  0x19   :  { %42 = dma.hbm_to_vmem [thread:$0]  %s481_s4, 16, %s40_s9, [#allocation6]  }
  0x1a   :  { %392 = dma.done.wait [#allocation3], 128  }
  0x1b   :  { %393 = vsyncadd [#allocation3], 4294967168 }
  0x1c   :  { %394 = dma.done.wait [#allocation6], 16  }
  0x1d   :  { %395 = vsyncadd [#allocation6], 4294967280  ;;  %v402_v0 = vmov 0.0   ;;  %vm403_vm0 = vmmov 0   ;;  %v325_v1 = vld [vmem:[#allocation2] sm:$0xff]   ;;  %vm71_vm1 = vcmask 130048   ;;  %v252_v33 = vlaneseq }
  0x1e   :  { %296 = vmatprep.subr.bf16.mxu0 %v402_v0  ;;  %298 = vmatprep.mubr.msk.bf16.mxu0 %vm403_vm0, %v402_v0  ;;  %v54_v2 = vld [vmem:[%s477_s0] sm:$0xff]  ;;  %v326_v4 = vld [vmem:[%s480_s3 + $0x8] sm:$0xff]   ;;  %vm140_vm2 = vcmask 261120  }
  0x1f   :  { %302 = vmatprep.subr.bf16.mxu1 %v402_v0  ;;  %306 = vmatprep.mubr.msk.bf16.mxu1 %vm403_vm0, %v402_v0  ;;  %v55_v3 = vpack.c.bf16 %v54_v2, %v54_v2  ;;  %v327_v5 = vld [vmem:[%s480_s3] sm:$0xff]   ;;  %v328_v6 = vld [vmem:[%s482_s5 + $0x8] sm:$0xff]   ;;  %v253_v34 = vand.u32 127, %v252_v33 }
  0x20   :  { %297 = vmatpush3.bf16.msra.mxu0 %v325_v1  ;;  %303 = vmatpush3.bf16.msra.mxu1 %v326_v4  ;;  %v277_v7 = vld [vmem:[%s479_s2] ss:$0 sm:$0xff]  ;;  %v280_v16 = vld [vmem:[#allocation5] ss:$0 sm:$0xff] }
  0x21   :  { %310 = vmatprep.subr.bf16.mxu0 %v402_v0  ;;  %304 = vmatprep.subr.bf16.mxu1 %v402_v0  ;;  %v329_v15 = vld [vmem:[%s482_s5] sm:$0xff]   ;;  %s404_s5 = smov [#allocation7]   ;;  %vm258_vm3 = vcmp.lt.s32.totalorder %v253_v34, 8 }
  0x22   :  { %v284_v24 = vld [vmem:[%s483_s6] ss:$0 sm:$0xff]  ;;  %s267_s23 = sshll.u32 %s404_s5, 4  ;;  %s268_s23 = int_to_ptr.vmem [resolvable:$true] %s267_s23 }
  0x23   :  { %299 = vmatmul.mubr.msk.bf16.vlgmr.msra.gmra.mxu0 %vm71_vm1, %v55_v3  ;;  %s372_s6 = scalar_lea.vmem %s268_s23, 128  ;;  %p377_p11 = scmp.lt.s32.totalorder %s268_s23, %s268_s23 }
  0x24   :  { %314 = vmatprep.mubr.msk.bf16.mxu0 %vm403_vm0, %v402_v0  ;;  %305 = vmatpush3.bf16.msra.mxu1 %v327_v5  ;;  %p373_p10 = scmp.ne.s32.totalorder %s268_s23, %s372_s6  ;;  %p378_p12 = scmp.lt.s32.totalorder %s372_s6, %s372_s6 }
  0x25   :  { %311 = vmatpush3.bf16.msra.mxu0 %v328_v6 }
  0x26   :  { %312 = vmatprep.subr.bf16.mxu0 %v402_v0  ;;  %p379_p13 = por %p378_p12, %p377_p11 }
  0x28   :  { %p380_p0 = pnand %p379_p13, %p373_p10 }
  0x29   :  { %313 = vmatpush3.bf16.msra.mxu0 %v329_v15 }
  0xe3   :  { %v109_v8 = vpop.f32.mrf.mxu0 }
  0xe4   :  { %v110_v9 = vadd.f32 %v277_v7, %v109_v8 }
  0xe5   :  { %v300_v10 = vpop.f32.mrf.mxu0 }
  0xe6   :  { %v115_v11 = vmax.f32 %v110_v9, 0.0 }
  0xe7   :  { %v112_v12 = vpop.f32.mrf.mxu0 }
  0xe8   :  { %v116_v13 = vpack.c.bf16 %v115_v11, %v115_v11 }
  0xe9   :  { %v301_v14 = vpop.f32.mrf.mxu0 }
  0xea   :  { %307 = vmatmul.mubr.msk.bf16.vlgmr.msra.gmra.mxu1 %vm140_vm2, %v116_v13 }
 0x1aa   :  { %v178_v17 = vpop.f32.mrf.mxu1 }
 0x1ab   :  { %v179_v18 = vadd.f32 %v280_v16, %v178_v17 }
 0x1ac   :  { %v308_v19 = vpop.f32.mrf.mxu1 }
 0x1ad   :  { %v184_v20 = vmax.f32 %v179_v18, 0.0 }
 0x1ae   :  { %v181_v21 = vpop.f32.mrf.mxu1 }
 0x1af   :  { %v185_v22 = vpack.c.bf16 %v184_v20, %v184_v20 }
 0x1b0   :  { %v309_v23 = vpop.f32.mrf.mxu1 }
 0x1b1   :  { %315 = vmatmul.mubr.msk.bf16.vlgmr.msra.gmra.mxu0 %vm140_vm2, %v185_v22 }
 0x271   :  { %v246_v25 = vpop.f32.mrf.mxu0 }
 0x272   :  { %v247_v26 = vadd.f32 %v284_v24, %v246_v25 }
 0x273   :  { %v316_v27 = vpop.f32.mrf.mxu0 }
 0x274   :  { %v254_v28 = vmax.f32 %v247_v26, -20.0 }
 0x275   :  { %v249_v29 = vpop.f32.mrf.mxu0 }
 0x276   :  { %v255_v30 = vmin.f32 %v254_v28, 2.0 }
 0x277   :  { %v317_v31 = vpop.f32.mrf.mxu0 }
 0x278   :  { %v256_v32 = vmul.f32 1.442695, %v255_v30 }
 0x27a   :  { %330 = vpow2.f32 %v256_v32 }
 0x287   :  { %v331_v35 = vpop.eup %330 }
 0x288   :  { %v259_v36 = vsel %vm258_vm3, %v247_v26, %v331_v35 }
 0x289   :  { %260 = vst.msk [vmem:[#allocation7] sm:$0xff] %vm71_vm1, %v259_v36 }
 0x28a   :  { %383 = shalt.err (!%p380_p0)
}
 0x28b   :  { %270 = dma.vmem_to_hbm [thread:$0]  %s268_s23, 128, %s484_s7, [#allocation4]  }
 0x28c   :  { %396 = dma.done.wait [#allocation4], 128  }
 0x28d   :  { %397 = vsyncadd [#allocation4], 4294967168 }
 0x28e   :  { %274 = vsyncpa [#allocation3], 1 }
 0x28f   :  { %275 = vsyncpa [#allocation6], 1 }
 0x290   :  { %276 = vsyncpa [#allocation4], 1 }

// kernel: tpu_custom_call.1
= control target key start
LH: loop header
LB: loop body
LE: loop exit
PB: predicated region body
PF: predicated region fallthrough
CT: control target
= control target key end

     0   :  { %12 = vsyncpa [#allocation3], 0  ;;  %s477_s0 = inlined_call_operand.vmem [shape: f32[8,16], index: 0, kind: input, shape index: {}]   ;;  %s478_s1 = inlined_call_operand.hbm [shape: bf16[16,32], index: 1, kind: input, shape index: {}]   ;;  %s479_s2 = inlined_call_operand.vmem [shape: f32[1,32], index: 2, kind: input, shape index: {}]   ;;  %s480_s3 = inlined_call_operand.vmem [shape: bf16[32,32], index: 3, kind: input, shape index: {}]   ;;  %s481_s4 = inlined_call_operand.hbm [shape: f32[1,32], index: 4, kind: input, shape index: {}]   ;;  %s482_s5 = inlined_call_operand.vmem [shape: bf16[32,16], index: 5, kind: input, shape index: {}]   ;;  %s483_s6 = inlined_call_operand.vmem [shape: f32[1,16], index: 6, kind: input, shape index: {}]   ;;  %s484_s7 = inlined_call_operand.hbm [shape: f32[8,16], index: 7, kind: output, shape index: {}]  }
   0x1   :  { %13 = vsyncpa [#allocation6], 0 }
   0x2   :  { %14 = vsyncpa [#allocation4], 0  ;;  %s398_s24 = smov [#allocation2]  }
   0x3   :  { %s22_s25 = sshll.u32 %s398_s24, 4  ;;  %s23_s25 = int_to_ptr.vmem [resolvable:$true] %s22_s25 }
   0x4   :  { %s340_s26 = scalar_lea.vmem %s23_s25, 128  ;;  %p345_p1 = scmp.lt.s32.totalorder %s23_s25, %s23_s25 }
   0x5   :  { %p341_p0 = scmp.ne.s32.totalorder %s23_s25, %s340_s26  ;;  %p346_p2 = scmp.lt.s32.totalorder %s340_s26, %s340_s26 }
   0x7   :  { %p347_p3 = por %p346_p2, %p345_p1 }
   0x9   :  { %p348_p4 = pnand %p347_p3, %p341_p0 }
   0xb   :  { %351 = shalt.err (!%p348_p4)
}
   0xc   :  { %s399_s27 = smov 64   ;;  %s400_s28 = smov 4  }
   0xd   :  { %28 = dma.hbm_to_vmem [thread:$0]  %s478_s1, 128, %s23_s25, [#allocation3], %s399_s27, %s399_s27, %s400_s28  }
   0xe   :  { %s401_s8 = smov [#allocation5]  }
   0xf   :  { %s39_s9 = sshll.u32 %s401_s8, 4  ;;  %s40_s9 = int_to_ptr.vmem [resolvable:$true] %s39_s9 }
  0x10   :  { %s360_s10 = scalar_lea.vmem %s40_s9, 16  ;;  %s364_s11 = scalar_lea.vmem %s40_s9, 32 }
  0x11   :  { %p361_p5 = scmp.ne.s32.totalorder %s40_s9, %s360_s10  ;;  %p365_p6 = scmp.lt.s32.totalorder %s40_s9, %s40_s9 }
  0x12   :  { %p366_p7 = scmp.lt.s32.totalorder %s364_s11, %s360_s10 }
  0x14   :  { %p367_p8 = por %p366_p7, %p365_p6 }
  0x16   :  { %p368_p9 = pnand %p367_p8, %p361_p5 }
  0x18   :  { %371 = shalt.err (!%p368_p9)
}
  0x19   :  { %42 = dma.hbm_to_vmem [thread:$0]  %s481_s4, 16, %s40_s9, [#allocation6]  }
  0x1a   :  { %392 = dma.done.wait [#allocation3], 128  }
  0x1b   :  { %393 = vsyncadd [#allocation3], 4294967168 }
  0x1c   :  { %394 = dma.done.wait [#allocation6], 16  }
  0x1d   :  { %395 = vsyncadd [#allocation6], 4294967280  ;;  %v402_v0 = vmov 0.0   ;;  %vm403_vm0 = vmmov 0   ;;  %v325_v1 = vld [vmem:[#allocation2] sm:$0xff]   ;;  %vm71_vm1 = vcmask 130048   ;;  %v252_v33 = vlaneseq }
  0x1e   :  { %296 = vmatprep.subr.bf16.mxu0 %v402_v0  ;;  %298 = vmatprep.mubr.msk.bf16.mxu0 %vm403_vm0, %v402_v0  ;;  %v54_v2 = vld [vmem:[%s477_s0] sm:$0xff]  ;;  %v326_v4 = vld [vmem:[%s480_s3 + $0x8] sm:$0xff]   ;;  %vm140_vm2 = vcmask 261120  }
  0x1f   :  { %302 = vmatprep.subr.bf16.mxu1 %v402_v0  ;;  %306 = vmatprep.mubr.msk.bf16.mxu1 %vm403_vm0, %v402_v0  ;;  %v55_v3 = vpack.c.bf16 %v54_v2, %v54_v2  ;;  %v327_v5 = vld [vmem:[%s480_s3] sm:$0xff]   ;;  %v328_v6 = vld [vmem:[%s482_s5 + $0x8] sm:$0xff]   ;;  %v253_v34 = vand.u32 127, %v252_v33 }
  0x20   :  { %297 = vmatpush3.bf16.msra.mxu0 %v325_v1  ;;  %303 = vmatpush3.bf16.msra.mxu1 %v326_v4  ;;  %v277_v7 = vld [vmem:[%s479_s2] ss:$0 sm:$0xff]  ;;  %v280_v16 = vld [vmem:[#allocation5] ss:$0 sm:$0xff] }
  0x21   :  { %310 = vmatprep.subr.bf16.mxu0 %v402_v0  ;;  %304 = vmatprep.subr.bf16.mxu1 %v402_v0  ;;  %v329_v15 = vld [vmem:[%s482_s5] sm:$0xff]   ;;  %s404_s5 = smov [#allocation7]   ;;  %vm258_vm3 = vcmp.lt.s32.totalorder %v253_v34, 8 }
  0x22   :  { %v284_v24 = vld [vmem:[%s483_s6] ss:$0 sm:$0xff]  ;;  %s267_s23 = sshll.u32 %s404_s5, 4  ;;  %s268_s23 = int_to_ptr.vmem [resolvable:$true] %s267_s23 }
  0x23   :  { %299 = vmatmul.mubr.msk.bf16.vlgmr.msra.gmra.mxu0 %vm71_vm1, %v55_v3  ;;  %s372_s6 = scalar_lea.vmem %s268_s23, 128  ;;  %p377_p11 = scmp.lt.s32.totalorder %s268_s23, %s268_s23 }
  0x24   :  { %314 = vmatprep.mubr.msk.bf16.mxu0 %vm403_vm0, %v402_v0  ;;  %305 = vmatpush3.bf16.msra.mxu1 %v327_v5  ;;  %p373_p10 = scmp.ne.s32.totalorder %s268_s23, %s372_s6  ;;  %p378_p12 = scmp.lt.s32.totalorder %s372_s6, %s372_s6 }
  0x25   :  { %311 = vmatpush3.bf16.msra.mxu0 %v328_v6 }
  0x26   :  { %312 = vmatprep.subr.bf16.mxu0 %v402_v0  ;;  %p379_p13 = por %p378_p12, %p377_p11 }
  0x28   :  { %p380_p0 = pnand %p379_p13, %p373_p10 }
  0x29   :  { %313 = vmatpush3.bf16.msra.mxu0 %v329_v15 }
  0xe3   :  { %v109_v8 = vpop.f32.mrf.mxu0 }
  0xe4   :  { %v110_v9 = vadd.f32 %v277_v7, %v109_v8 }
  0xe5   :  { %v300_v10 = vpop.f32.mrf.mxu0 }
  0xe6   :  { %v115_v11 = vmax.f32 %v110_v9, 0.0 }
  0xe7   :  { %v112_v12 = vpop.f32.mrf.mxu0 }
  0xe8   :  { %v116_v13 = vpack.c.bf16 %v115_v11, %v115_v11 }
  0xe9   :  { %v301_v14 = vpop.f32.mrf.mxu0 }
  0xea   :  { %307 = vmatmul.mubr.msk.bf16.vlgmr.msra.gmra.mxu1 %vm140_vm2, %v116_v13 }
 0x1aa   :  { %v178_v17 = vpop.f32.mrf.mxu1 }
 0x1ab   :  { %v179_v18 = vadd.f32 %v280_v16, %v178_v17 }
 0x1ac   :  { %v308_v19 = vpop.f32.mrf.mxu1 }
 0x1ad   :  { %v184_v20 = vmax.f32 %v179_v18, 0.0 }
 0x1ae   :  { %v181_v21 = vpop.f32.mrf.mxu1 }
 0x1af   :  { %v185_v22 = vpack.c.bf16 %v184_v20, %v184_v20 }
 0x1b0   :  { %v309_v23 = vpop.f32.mrf.mxu1 }
 0x1b1   :  { %315 = vmatmul.mubr.msk.bf16.vlgmr.msra.gmra.mxu0 %vm140_vm2, %v185_v22 }
 0x271   :  { %v246_v25 = vpop.f32.mrf.mxu0 }
 0x272   :  { %v247_v26 = vadd.f32 %v284_v24, %v246_v25 }
 0x273   :  { %v316_v27 = vpop.f32.mrf.mxu0 }
 0x274   :  { %v254_v28 = vmax.f32 %v247_v26, -20.0 }
 0x275   :  { %v249_v29 = vpop.f32.mrf.mxu0 }
 0x276   :  { %v255_v30 = vmin.f32 %v254_v28, 2.0 }
 0x277   :  { %v317_v31 = vpop.f32.mrf.mxu0 }
 0x278   :  { %v256_v32 = vmul.f32 1.442695, %v255_v30 }
 0x27a   :  { %330 = vpow2.f32 %v256_v32 }
 0x287   :  { %v331_v35 = vpop.eup %330 }
 0x288   :  { %v259_v36 = vsel %vm258_vm3, %v247_v26, %v331_v35 }
 0x289   :  { %260 = vst.msk [vmem:[#allocation7] sm:$0xff] %vm71_vm1, %v259_v36 }
 0x28a   :  { %383 = shalt.err (!%p380_p0)
}
 0x28b   :  { %270 = dma.vmem_to_hbm [thread:$0]  %s268_s23, 128, %s484_s7, [#allocation4]  }
 0x28c   :  { %396 = dma.done.wait [#allocation4], 128  }
 0x28d   :  { %397 = vsyncadd [#allocation4], 4294967168 }
 0x28e   :  { %274 = vsyncpa [#allocation3], 1 }
 0x28f   :  { %275 = vsyncpa [#allocation6], 1 }
 0x290   :  { %276 = vsyncpa [#allocation4], 1 }

</bundles_post_ra>
